<compile_context>
chip_gen: v6e
topology: v6e:2x2x1
jax: 0.10.0
libtpu: 0.0.40
codegen_flags: <defaults>
</compile_context>

<pallas_src>
import functools

import jax
import jax.numpy as jnp
from jax.experimental import pallas as pl
from jax.experimental.pallas import tpu as pltpu

_OUT_PAD = 128        # lane width used for the output matmul / softmax
_NEG_BIG = -1.0e30    # padded-logit bias -> exp() == 0 in softmax
_MAX_TM = 2048        # max batch tile (rows per grid step)


def _make_kernel(activation: str, out_size: int):
    if activation == "tanh":
        act = jnp.tanh
    else:  # LeakyReLU (PyTorch default negative_slope=0.01)
        act = lambda v: jnp.where(v > 0, v, 0.01 * v)

    def kernel(x_ref, w1_ref, b1_ref, w2_ref, b2_ref, w3_ref, b3_ref, o_ref):
        x = x_ref[...]                                   # f32 tile (tm, in)

        # hidden_layer + activation
        h = act(jnp.dot(x, w1_ref[...], preferred_element_type=jnp.float32)
                + b1_ref[...])

        # hidden_layer2 applied 4 times (shared weights).
        # Hoist the bias broadcast (JAX does not CSE broadcast_in_dim).
        w2 = w2_ref[...]
        b2b = jnp.broadcast_to(b2_ref[...], h.shape)
        for _ in range(4):
            h = act(jnp.dot(h, w2, preferred_element_type=jnp.float32) + b2b)

        # output_layer, computed at 128 lanes (padded bias = -1e30 so padded
        # lanes contribute exp()==0 to the softmax denominator).
        logits = (jnp.dot(h, w3_ref[...], preferred_element_type=jnp.float32)
                  + b3_ref[...])

        # Numerically-stable softmax over the last axis (exact divide; the
        # denominator is a (tm, 1) column so this is essentially free).
        m = jnp.max(logits, axis=-1, keepdims=True)
        e = jnp.exp(logits - m)
        denom = jnp.sum(e, axis=-1, keepdims=True)

        # Store only the real output columns (no padded slab to HBM).
        o_ref[...] = (e[:, :out_size] / denom).astype(o_ref.dtype)

    return kernel


def prepare_params(params, out_pad: int = _OUT_PAD):
    """One-time conversion of PyTorch-layout params to kernel layout.

    Transposes weights to [in, out], reshapes biases to [1, out], and pads the
    output layer to `out_pad` lanes (zero weight columns, -1e30 bias) so the
    final matmul / softmax run lane-dense while staying mathematically exact.

    Returns (arrays_dict, out_size); out_size is a plain Python int and must
    be passed to neural_network_forward as the static `out_size` argument.
    """
    w1t = jnp.asarray(params["hidden_layer.weight"]).T          # (in, hidden)
    b1 = jnp.asarray(params["hidden_layer.bias"]).reshape(1, -1)
    w2t = jnp.asarray(params["hidden_layer2.weight"]).T         # (hidden, hidden)
    b2 = jnp.asarray(params["hidden_layer2.bias"]).reshape(1, -1)

    w3 = jnp.asarray(params["output_layer.weight"])              # (out, hidden)
    b3 = jnp.asarray(params["output_layer.bias"])                # (out,)
    out_size = int(w3.shape[0])
    pad = out_pad - out_size
    w3t = jnp.pad(w3.T, ((0, 0), (0, pad)))                      # (hidden, out_pad)
    b3p = jnp.pad(b3, (0, pad), constant_values=_NEG_BIG).reshape(1, -1)

    arrays = {"w1t": w1t, "b1": b1, "w2t": w2t, "b2": b2, "w3t": w3t, "b3": b3p}
    return arrays, out_size


@functools.partial(jax.jit, static_argnames=("out_size", "activation"))
def neural_network_forward(x, prepared, out_size, activation: str = "tanh"):
    """x: [B, input_size] float32. prepared: arrays dict from prepare_params()."""
    w1t, b1 = prepared["w1t"], prepared["b1"]
    w2t, b2 = prepared["w2t"], prepared["b2"]
    w3t, b3 = prepared["w3t"], prepared["b3"]

    x = x.astype(jnp.float32)
    B, in_size = x.shape
    hidden = w1t.shape[1]
    out_pad = w3t.shape[1]

    # Batch tile: multiple of 8 (f32 sublane), capped at _MAX_TM, sized to
    # ~ceil(B/2) so the grid has >= 2 steps when B > 8 (v7x megacore).
    tm = min(_MAX_TM, max(8, pl.cdiv(pl.cdiv(B, 2), 8) * 8))
    grid = (pl.cdiv(B, tm),)   # ragged last block handled by Pallas masking

    full = lambda a: pl.BlockSpec(a.shape, lambda i: (0,) * a.ndim)

    cost = pl.CostEstimate(
        flops=2 * B * (in_size * hidden + 4 * hidden * hidden + hidden * out_pad),
        transcendentals=B * (5 * hidden + out_pad),
        bytes_accessed=4 * (B * in_size + B * out_size
                            + w1t.size + b1.size + w2t.size + b2.size
                            + w3t.size + b3.size),
    )

    out = pl.pallas_call(
        _make_kernel(activation, out_size),
        out_shape=jax.ShapeDtypeStruct((B, out_size), jnp.float32),
        grid=grid,
        in_specs=[
            pl.BlockSpec((tm, in_size), lambda i: (i, 0)),   # x: tiled over batch
            full(w1t), full(b1),                             # weights: resident
            full(w2t), full(b2),
            full(w3t), full(b3),
        ],
        out_specs=pl.BlockSpec((tm, out_size), lambda i: (i, 0)),
        compiler_params=pltpu.CompilerParams(
            dimension_semantics=("parallel",),
            vmem_limit_bytes=32 * 1024 * 1024),
        cost_estimate=cost,
    )(x, w1t, b1, w2t, b2, w3t, b3)

    return out


def init_params(key, input_size, hidden_size, output_size):
    """Deterministic PyTorch-style init: U(-1/sqrt(fan_in), 1/sqrt(fan_in))."""
    def linear(key, fan_in, fan_out):
        kw, kb = jax.random.split(key)
        bound = 1.0 / jnp.sqrt(jnp.float32(fan_in))
        w = jax.random.uniform(kw, (fan_out, fan_in), jnp.float32, -bound, bound)
        b = jax.random.uniform(kb, (fan_out,), jnp.float32, -bound, bound)
        return w, b

    k1, k2, k3 = jax.random.split(key, 3)
    w1, b1 = linear(k1, input_size, hidden_size)
    w2, b2 = linear(k2, hidden_size, hidden_size)
    w3, b3 = linear(k3, hidden_size, output_size)
    return {
        "hidden_layer.weight": w1, "hidden_layer.bias": b1,
        "hidden_layer2.weight": w2, "hidden_layer2.bias": b2,
        "output_layer.weight": w3, "output_layer.bias": b3,
    }


def _ref_forward(x, p, activation="tanh"):
    act = jnp.tanh if activation == "tanh" else (lambda v: jnp.where(v > 0, v, 0.01 * v))
    h = act(x @ p["hidden_layer.weight"].T + p["hidden_layer.bias"])
    for _ in range(4):
        h = act(h @ p["hidden_layer2.weight"].T + p["hidden_layer2.bias"])
    logits = h @ p["output_layer.weight"].T + p["output_layer.bias"]
    return jax.nn.softmax(logits, axis=1)


if __name__ == "__main__":
    # TicTacToe-ish sizes: 9 board cells in, 9 move probabilities out.
    input_size, hidden_size, output_size = 9, 32, 9

    key = jax.random.PRNGKey(0)
    kx, kx2, kp = jax.random.split(key, 3)
    params = init_params(kp, input_size, hidden_size, output_size)

    # One-time layout prep (transposes/padding hoisted out of the hot path).
    prepared, out_size = prepare_params(params)

    # Small batch (single, partially-filled tile).
    x = jax.random.normal(kx, (2, input_size), dtype=jnp.float32)
    out = jax.block_until_ready(neural_network_forward(x, prepared, out_size))
    ref_out = _ref_forward(x, params)
    assert out.shape == (2, output_size)
    assert jnp.allclose(out, ref_out, atol=1e-5, rtol=1e-5), "mismatch vs reference (small)"
    assert jnp.allclose(jnp.sum(out, axis=1), 1.0, atol=1e-5), "softmax not normalized"

    # Slightly larger batch to exercise a multi-step grid and a ragged last block.
    x2 = jax.random.normal(kx2, (40, input_size), dtype=jnp.float32)
    out2 = jax.block_until_ready(neural_network_forward(x2, prepared, out_size))
    ref2 = _ref_forward(x2, params)
    assert out2.shape == (40, output_size)
    assert jnp.allclose(out2, ref2, atol=1e-5, rtol=1e-5), "mismatch vs reference (ragged)"

    print("KERNEL_OK")
</pallas_src>

<mosaic_0001>
module attributes {stable_mosaic.version = 11 : i64} {
  func.func @kernel(%arg0: i32, %arg1: memref<8x9xf32, #tpu.memory_space<vmem>>, %arg2: memref<9x32xf32, #tpu.memory_space<vmem>>, %arg3: memref<1x32xf32, #tpu.memory_space<vmem>>, %arg4: memref<32x32xf32, #tpu.memory_space<vmem>>, %arg5: memref<1x32xf32, #tpu.memory_space<vmem>>, %arg6: memref<32x128xf32, #tpu.memory_space<vmem>>, %arg7: memref<1x128xf32, #tpu.memory_space<vmem>>, %arg8: memref<8x9xf32, #tpu.memory_space<vmem>>) attributes {dimension_semantics = [#tpu.dimension_semantics<parallel>], iteration_bounds = array<i64: 1>, scalar_prefetch = 0 : i64, scratch_operands = 0 : i64, tpu.core_type = #tpu.core_type<tc>, window_params = [{transform_indices = @transform_0, window_bounds = array<i64: 8, 9>}, {pipeline_mode = #tpu.pipeline_mode<synchronous>, transform_indices = @transform_1, window_bounds = array<i64: 9, 32>}, {pipeline_mode = #tpu.pipeline_mode<synchronous>, transform_indices = @transform_2, window_bounds = array<i64: 1, 32>}, {pipeline_mode = #tpu.pipeline_mode<synchronous>, transform_indices = @transform_3, window_bounds = array<i64: 32, 32>}, {pipeline_mode = #tpu.pipeline_mode<synchronous>, transform_indices = @transform_4, window_bounds = array<i64: 1, 32>}, {pipeline_mode = #tpu.pipeline_mode<synchronous>, transform_indices = @transform_5, window_bounds = array<i64: 32, 128>}, {pipeline_mode = #tpu.pipeline_mode<synchronous>, transform_indices = @transform_6, window_bounds = array<i64: 1, 128>}, {transform_indices = @transform_7, window_bounds = array<i64: 8, 9>}]} {
    %c0 = arith.constant 0 : index
    %c0_0 = arith.constant 0 : index
    %0 = vector.load %arg1[%c0, %c0_0] : memref<8x9xf32, #tpu.memory_space<vmem>>, vector<8x9xf32>
    %c0_1 = arith.constant 0 : index
    %c0_2 = arith.constant 0 : index
    %1 = vector.load %arg2[%c0_1, %c0_2] : memref<9x32xf32, #tpu.memory_space<vmem>>, vector<9x32xf32>
    %cst = arith.constant dense<0.000000e+00> : vector<8x32xf32>
    %2 = tpu.matmul %0, %1, %cst {dimension_numbers = #tpu.dot_dimension_numbers<[1], [0], [0], [1], [0, 0, 1, 1], [], []>} : vector<8x9xf32>, vector<9x32xf32>, vector<8x32xf32> -> vector<8x32xf32>
    %c0_3 = arith.constant 0 : index
    %c0_4 = arith.constant 0 : index
    %3 = vector.load %arg3[%c0_3, %c0_4] : memref<1x32xf32, #tpu.memory_space<vmem>>, vector<1x32xf32>
    %4 = vector.broadcast %3 : vector<1x32xf32> to vector<8x32xf32>
    %5 = arith.addf %2, %4 : vector<8x32xf32>
    %6 = math.tanh %5 : vector<8x32xf32>
    %c0_5 = arith.constant 0 : index
    %c0_6 = arith.constant 0 : index
    %7 = vector.load %arg4[%c0_5, %c0_6] : memref<32x32xf32, #tpu.memory_space<vmem>>, vector<32x32xf32>
    %c0_7 = arith.constant 0 : index
    %c0_8 = arith.constant 0 : index
    %8 = vector.load %arg5[%c0_7, %c0_8] : memref<1x32xf32, #tpu.memory_space<vmem>>, vector<1x32xf32>
    %9 = vector.shape_cast %8 : vector<1x32xf32> to vector<1x32xf32>
    %10 = vector.broadcast %9 : vector<1x32xf32> to vector<8x32xf32>
    %cst_9 = arith.constant dense<0.000000e+00> : vector<8x32xf32>
    %11 = tpu.matmul %6, %7, %cst_9 {dimension_numbers = #tpu.dot_dimension_numbers<[1], [0], [0], [1], [0, 0, 1, 1], [], []>} : vector<8x32xf32>, vector<32x32xf32>, vector<8x32xf32> -> vector<8x32xf32>
    %12 = arith.addf %11, %10 : vector<8x32xf32>
    %13 = math.tanh %12 : vector<8x32xf32>
    %cst_10 = arith.constant dense<0.000000e+00> : vector<8x32xf32>
    %14 = tpu.matmul %13, %7, %cst_10 {dimension_numbers = #tpu.dot_dimension_numbers<[1], [0], [0], [1], [0, 0, 1, 1], [], []>} : vector<8x32xf32>, vector<32x32xf32>, vector<8x32xf32> -> vector<8x32xf32>
    %15 = arith.addf %14, %10 : vector<8x32xf32>
    %16 = math.tanh %15 : vector<8x32xf32>
    %cst_11 = arith.constant dense<0.000000e+00> : vector<8x32xf32>
    %17 = tpu.matmul %16, %7, %cst_11 {dimension_numbers = #tpu.dot_dimension_numbers<[1], [0], [0], [1], [0, 0, 1, 1], [], []>} : vector<8x32xf32>, vector<32x32xf32>, vector<8x32xf32> -> vector<8x32xf32>
    %18 = arith.addf %17, %10 : vector<8x32xf32>
    %19 = math.tanh %18 : vector<8x32xf32>
    %cst_12 = arith.constant dense<0.000000e+00> : vector<8x32xf32>
    %20 = tpu.matmul %19, %7, %cst_12 {dimension_numbers = #tpu.dot_dimension_numbers<[1], [0], [0], [1], [0, 0, 1, 1], [], []>} : vector<8x32xf32>, vector<32x32xf32>, vector<8x32xf32> -> vector<8x32xf32>
    %21 = arith.addf %20, %10 : vector<8x32xf32>
    %22 = math.tanh %21 : vector<8x32xf32>
    %c0_13 = arith.constant 0 : index
    %c0_14 = arith.constant 0 : index
    %23 = vector.load %arg6[%c0_13, %c0_14] : memref<32x128xf32, #tpu.memory_space<vmem>>, vector<32x128xf32>
    %cst_15 = arith.constant dense<0.000000e+00> : vector<8x128xf32>
    %24 = tpu.matmul %22, %23, %cst_15 {dimension_numbers = #tpu.dot_dimension_numbers<[1], [0], [0], [1], [0, 0, 1, 1], [], []>} : vector<8x32xf32>, vector<32x128xf32>, vector<8x128xf32> -> vector<8x128xf32>
    %c0_16 = arith.constant 0 : index
    %c0_17 = arith.constant 0 : index
    %25 = vector.load %arg7[%c0_16, %c0_17] : memref<1x128xf32, #tpu.memory_space<vmem>>, vector<1x128xf32>
    %26 = vector.broadcast %25 : vector<1x128xf32> to vector<8x128xf32>
    %27 = arith.addf %24, %26 : vector<8x128xf32>
    %cst_18 = arith.constant dense<0xFF800000> : vector<8xf32>
    %28 = vector.multi_reduction <maximumf>, %27, %cst_18 [1] : vector<8x128xf32> to vector<8xf32>
    %29 = vector.shape_cast %28 : vector<8xf32> to vector<8x1xf32>
    %30 = vector.broadcast %29 : vector<8x1xf32> to vector<8x128xf32>
    %31 = arith.subf %27, %30 : vector<8x128xf32>
    %32 = math.exp %31 : vector<8x128xf32>
    %cst_19 = arith.constant dense<0.000000e+00> : vector<8xf32>
    %33 = vector.multi_reduction <add>, %32, %cst_19 [1] : vector<8x128xf32> to vector<8xf32>
    %34 = vector.shape_cast %33 : vector<8xf32> to vector<8x1xf32>
    %35 = vector.extract_strided_slice %32 {offsets = [0, 0], sizes = [8, 9], strides = [1, 1]} : vector<8x128xf32> to vector<8x9xf32>
    %36 = vector.broadcast %34 : vector<8x1xf32> to vector<8x9xf32>
    %37 = arith.divf %35, %36 : vector<8x9xf32>
    %c0_20 = arith.constant 0 : index
    %c0_21 = arith.constant 0 : index
    %38 = vector.load %arg8[%c0_20, %c0_21] : memref<8x9xf32, #tpu.memory_space<vmem>>, vector<8x9xf32>
    tpu.vector_store %arg8[%c0_20, %c0_21], %37 {strides = array<i32>} : memref<8x9xf32, #tpu.memory_space<vmem>>, vector<8x9xf32>,
    return
  }
  func.func @transform_0(%arg0: i32) -> (i32, i32) {
    %c0_i32 = arith.constant 0 : i32
    %c0_i32_0 = arith.constant 0 : i32
    return %arg0, %c0_i32 : i32, i32
  }
  func.func @transform_1(%arg0: i32) -> (i32, i32) {
    %c0_i32 = arith.constant 0 : i32
    %c0_i32_0 = arith.constant 0 : i32
    %c0_i32_1 = arith.constant 0 : i32
    return %c0_i32, %c0_i32_0 : i32, i32
  }
  func.func @transform_2(%arg0: i32) -> (i32, i32) {
    %c0_i32 = arith.constant 0 : i32
    %c0_i32_0 = arith.constant 0 : i32
    %c0_i32_1 = arith.constant 0 : i32
    return %c0_i32, %c0_i32_0 : i32, i32
  }
  func.func @transform_3(%arg0: i32) -> (i32, i32) {
    %c0_i32 = arith.constant 0 : i32
    %c0_i32_0 = arith.constant 0 : i32
    %c0_i32_1 = arith.constant 0 : i32
    return %c0_i32, %c0_i32_0 : i32, i32
  }
  func.func @transform_4(%arg0: i32) -> (i32, i32) {
    %c0_i32 = arith.constant 0 : i32
    %c0_i32_0 = arith.constant 0 : i32
    %c0_i32_1 = arith.constant 0 : i32
    return %c0_i32, %c0_i32_0 : i32, i32
  }
  func.func @transform_5(%arg0: i32) -> (i32, i32) {
    %c0_i32 = arith.constant 0 : i32
    %c0_i32_0 = arith.constant 0 : i32
    %c0_i32_1 = arith.constant 0 : i32
    return %c0_i32, %c0_i32_0 : i32, i32
  }
  func.func @transform_6(%arg0: i32) -> (i32, i32) {
    %c0_i32 = arith.constant 0 : i32
    %c0_i32_0 = arith.constant 0 : i32
    %c0_i32_1 = arith.constant 0 : i32
    return %c0_i32, %c0_i32_0 : i32, i32
  }
  func.func @transform_7(%arg0: i32) -> (i32, i32) {
    %c0_i32 = arith.constant 0 : i32
    %c0_i32_0 = arith.constant 0 : i32
    return %arg0, %c0_i32 : i32, i32
  }
}

</mosaic_0001>

<bundles_post_ra>
// kernel: neural_network_forward.1
= control target key start
LH: loop header
LB: loop body
LE: loop exit
PB: predicated region body
PF: predicated region fallthrough
CT: control target
= control target key end

     0   :  { %12 = vsyncpa [#allocation3], 0  ;;  %s956_s0 = inlined_call_operand.hbm [shape: f32[2,9], index: 0, kind: input, shape index: {}]   ;;  %s957_s1 = inlined_call_operand.hbm [shape: f32[9,32], index: 1, kind: input, shape index: {}]   ;;  %s958_s2 = inlined_call_operand.vmem [shape: f32[1,32], index: 2, kind: input, shape index: {}]   ;;  %s959_s3 = inlined_call_operand.hbm [shape: f32[32,32], index: 3, kind: input, shape index: {}]   ;;  %s960_s4 = inlined_call_operand.vmem [shape: f32[1,32], index: 4, kind: input, shape index: {}]   ;;  %s961_s5 = inlined_call_operand.hbm [shape: f32[32,128], index: 5, kind: input, shape index: {}]   ;;  %s962_s6 = inlined_call_operand.vmem [shape: f32[1,128], index: 6, kind: input, shape index: {}]   ;;  %s963_s7 = inlined_call_operand.hbm [shape: f32[2,9], index: 7, kind: output, shape index: {}]  }
   0x1   :  { %13 = vsyncpa [#allocation6], 0 }
   0x2   :  { %14 = vsyncpa [#allocation9], 0 }
   0x3   :  { %15 = vsyncpa [#allocation4], 0 }
   0x4   :  { %20 = vsyncadd [#allocation3], 96  ;;  %s825_s24 = smov [#allocation5]  }
   0x5   :  { %s33_s25 = sshll.u32 %s825_s24, 4  ;;  %s34_s25 = int_to_ptr.vmem [resolvable:$true] %s33_s25 }
   0x6   :  { %s725_s26 = scalar_lea.vmem %s34_s25, 256  ;;  %p730_p1 = scmp.lt.s32.totalorder %s34_s25, %s34_s25 }
   0x7   :  { %p726_p0 = scmp.ne.s32.totalorder %s34_s25, %s725_s26  ;;  %p731_p2 = scmp.lt.s32.totalorder %s725_s26, %s725_s26 }
   0x9   :  { %p732_p3 = por %p731_p2, %p730_p1 }
   0xb   :  { %p733_p4 = pnand %p732_p3, %p726_p0 }
   0xd   :  { %736 = shalt.err (!%p733_p4)
}
   0xe   :  { %s826_s27 = smov 128   ;;  %s827_s28 = smov 8  }
   0xf   :  { %39 = dma.hbm_to_vmem [thread:$0]  %s957_s1, 256, %s34_s25, [#allocation6], %s826_s27, %s826_s27, %s827_s28  }
  0x10   :  { %s828_s8 = smov [#allocation2]  }
  0x11   :  { %s21_s9 = sshll.u32 %s828_s8, 4  ;;  %s22_s9 = int_to_ptr.vmem [resolvable:$true] %s21_s9 }
  0x12   :  { %s745_s10 = scalar_lea.vmem %s22_s9, 32  ;;  %s749_s11 = scalar_lea.vmem %s22_s9, 128 }
  0x13   :  { %p746_p5 = scmp.ne.s32.totalorder %s22_s9, %s745_s10  ;;  %p750_p6 = scmp.lt.s32.totalorder %s22_s9, %s22_s9 }
  0x14   :  { %p751_p7 = scmp.lt.s32.totalorder %s749_s11, %s745_s10 }
  0x16   :  { %p752_p8 = por %p751_p7, %p750_p6 }
  0x18   :  { %p753_p9 = pnand %p752_p8, %p746_p5 }
  0x1a   :  { %756 = shalt.err (!%p753_p9)
}
  0x1b   :  { %s829_s12 = smov 32   ;;  %s830_s13 = smov 2  }
  0x1c   :  { %27 = dma.hbm_to_vmem [thread:$0]  %s956_s0, 32, %s22_s9, [#allocation3], %s829_s12, %s829_s12, %s830_s13  }
  0x1d   :  { %s831_s1 = smov [#allocation7]   ;;  %s832_s17 = smov [#allocation8]  }
  0x1e   :  { %s47_s16 = sshll.u32 %s831_s1, 4  ;;  %s61_s18 = sshll.u32 %s832_s17, 4  ;;  %s48_s16 = int_to_ptr.vmem [resolvable:$true] %s47_s16  ;;  %s62_s18 = int_to_ptr.vmem [resolvable:$true] %s61_s18 }
  0x1f   :  { %s765_s19 = scalar_lea.vmem %s48_s16, 512  ;;  %p770_p11 = scmp.lt.s32.totalorder %s48_s16, %s48_s16 }
  0x20   :  { %p766_p10 = scmp.ne.s32.totalorder %s48_s16, %s765_s19  ;;  %p771_p12 = scmp.lt.s32.totalorder %s765_s19, %s765_s19 }
  0x22   :  { %p772_p13 = por %p771_p12, %p770_p11 }
  0x24   :  { %p773_p0 = pnand %p772_p13, %p766_p10 }
  0x26   :  { %776 = shalt.err (!%p773_p0)
}
  0x27   :  { %53 = dma.hbm_to_vmem [thread:$0]  %s959_s3, 512, %s48_s16, [#allocation6], %s826_s27, %s826_s27, %s827_s28  }
  0x28   :  { %s785_s0 = scalar_lea.vmem %s62_s18, 512  ;;  %p790_p2 = scmp.lt.s32.totalorder %s62_s18, %s62_s18 }
  0x29   :  { %p786_p1 = scmp.ne.s32.totalorder %s62_s18, %s785_s0  ;;  %p791_p3 = scmp.lt.s32.totalorder %s785_s0, %s785_s0 }
  0x2b   :  { %p792_p4 = por %p791_p3, %p790_p2 }
  0x2d   :  { %p793_p5 = pnand %p792_p4, %p786_p1 }
  0x2f   :  { %796 = shalt.err (!%p793_p5)
}
  0x30   :  { %67 = dma.hbm_to_vmem [thread:$0]  %s961_s5, 512, %s62_s18, [#allocation9], %s826_s27, %s826_s27, %s827_s28  }
  0x31   :  { %817 = dma.done.wait [#allocation3], 128  }
  0x32   :  { %818 = vsyncadd [#allocation3], 4294967168 }
  0x33   :  { %819 = dma.done.wait [#allocation6], 768  }
  0x34   :  { %820 = vsyncadd [#allocation6], 4294966528 }
  0x35   :  { %821 = dma.done.wait [#allocation9], 512  }
  0x36   :  { %822 = vsyncadd [#allocation9], 4294966784  ;;  %v833_v0 = vmov 0.0   ;;  %vm834_vm0 = vmmov 0   ;;  %vm96_vm1 = vcmask 1040384   ;;  %v83_v2 = vld [vmem:[#allocation5] sm:$0xff] }
  0x37   :  { %630 = vmatprep.subr.mxu0 %v833_v0  ;;  %634 = vmatprep.mubr.msk.f32.mxu0 %vm834_vm0, %v833_v0  ;;  %v84_v1 = vld [vmem:[#allocation5 + $0x8] sm:$0x1]  ;;  %v82_v3 = vld [vmem:[#allocation2] sm:$0xff]  ;;  %vm92_vm2 = vcmask 72704   ;;  %v173_v5 = vld [vmem:[#allocation7 + $0x10] sm:$0xff]  ;;  %vm182_vm3 = vcmask 261120  }
  0x38   :  { %637 = vmatprep.subr.mxu1 %v833_v0  ;;  %645 = vmatprep.mubr.msk.f32.mxu1 %vm834_vm0, %v833_v0  ;;  %v174_v4 = vld [vmem:[#allocation7 + $0x18] sm:$0xff]  ;;  %v172_v6 = vld [vmem:[#allocation7 + $0x8] sm:$0xff]  ;;  %v171_v7 = vld [vmem:[#allocation7] sm:$0xff] }
  0x39   :  { %631 = vmatpush3.msk.msra.mxu0 %vm96_vm1, %v84_v1  ;;  %638 = vmatpush3.msra.mxu1 %v174_v4  ;;  %v592_v8 = vld [vmem:[%s958_s2] ss:$0 sm:$0xff]  ;;  %v482_v26 = vld [vmem:[#allocation8 + $0x18] sm:$0xff]  ;;  %v481_v27 = vld [vmem:[#allocation8 + $0x10] sm:$0xff] }
  0x3a   :  { %632 = vmatprep.subr.mxu0 %v833_v0  ;;  %639 = vmatprep.subr.mxu1 %v833_v0  ;;  %v595_v13 = vld [vmem:[%s960_s4] ss:$0 sm:$0xff]  ;;  %v479_v29 = vld [vmem:[#allocation8] sm:$0xff] }
  0x3b   :  { %633 = vmatpush3.msra.mxu0 %v83_v2  ;;  %640 = vmatpush3.msra.mxu1 %v173_v5  ;;  %v480_v28 = vld [vmem:[#allocation8 + $0x8] sm:$0xff] }
  0x3c   :  { %635 = vmatmul.mubr.msk.f32.vlgmr.msra.gmra.mxu0 %vm92_vm2, %v82_v3  ;;  %648 = vmatprep.subr.mxu0 %v833_v0  ;;  %v600_v34 = vld [vmem:[%s962_s6] ss:$0 sm:$0xff] }
  0x3d   :  { %656 = vmatprep.mubr.msk.f32.mxu0 %vm834_vm0, %v833_v0  ;;  %649 = vmatpush3.msra.mxu0 %v174_v4 }
  0x3e   :  { %650 = vmatprep.subr.mxu0 %v833_v0  ;;  %641 = vmatprep.subr.mxu1 %v833_v0 }
  0x3f   :  { %651 = vmatpush3.msra.mxu0 %v173_v5  ;;  %642 = vmatpush3.msra.mxu1 %v172_v6 }
  0x40   :  { %652 = vmatprep.subr.mxu0 %v833_v0  ;;  %643 = vmatprep.subr.mxu1 %v833_v0 }
  0x41   :  { %653 = vmatpush3.msra.mxu0 %v172_v6  ;;  %644 = vmatpush3.msra.mxu1 %v171_v7 }
  0x42   :  { %654 = vmatprep.subr.mxu0 %v833_v0  ;;  %659 = vmatprep.subr.mxu1 %v833_v0 }
  0x43   :  { %655 = vmatpush3.msra.mxu0 %v171_v7 }
  0x44   :  { %670 = vmatprep.subr.mxu0 %v833_v0 }
  0xfc   :  { %v166_v9 = vpop.f32.mrf.mxu0 }
  0xfd   :  { %v167_v10 = vadd.f32 %v592_v8, %v166_v9 }
  0xfe   :  { %v636_v11 = vpop.f32.mrf.mxu0 }
  0xff   :  { %703 = vtanh.f32 %v167_v10 }
 0x10c   :  { %v704_v12 = vpop.eup %703 }
 0x10d   :  { %646 = vmatmul.mubr.msk.f32.vlgmr.msra.gmra.mxu1 %vm182_vm3, %v704_v12 }
 0x10e   :  { %660 = vmatpush3.msra.mxu1 %v174_v4  ;;  %667 = vmatprep.mubr.msk.f32.mxu1 %vm834_vm0, %v833_v0 }
 0x10f   :  { %661 = vmatprep.subr.mxu1 %v833_v0 }
 0x110   :  { %662 = vmatpush3.msra.mxu1 %v173_v5 }
 0x111   :  { %663 = vmatprep.subr.mxu1 %v833_v0 }
 0x112   :  { %664 = vmatpush3.msra.mxu1 %v172_v6 }
 0x113   :  { %665 = vmatprep.subr.mxu1 %v833_v0 }
 0x114   :  { %666 = vmatpush3.msra.mxu1 %v171_v7 }
 0x115   :  { %681 = vmatprep.subr.mxu1 %v833_v0 }
 0x1cd   :  { %v252_v14 = vpop.f32.mrf.mxu1 }
 0x1ce   :  { %v253_v15 = vadd.f32 %v595_v13, %v252_v14 }
 0x1cf   :  { %v647_v16 = vpop.f32.mrf.mxu1 }
 0x1d0   :  { %705 = vtanh.f32 %v253_v15 }
 0x1dd   :  { %v706_v17 = vpop.eup %705 }
 0x1de   :  { %657 = vmatmul.mubr.msk.f32.vlgmr.msra.gmra.mxu0 %vm182_vm3, %v706_v17 }
 0x1df   :  { %671 = vmatpush3.msra.mxu0 %v174_v4  ;;  %678 = vmatprep.mubr.msk.f32.mxu0 %vm834_vm0, %v833_v0 }
 0x1e0   :  { %672 = vmatprep.subr.mxu0 %v833_v0 }
 0x1e1   :  { %673 = vmatpush3.msra.mxu0 %v173_v5 }
 0x1e2   :  { %674 = vmatprep.subr.mxu0 %v833_v0 }
 0x1e3   :  { %675 = vmatpush3.msra.mxu0 %v172_v6 }
 0x1e4   :  { %676 = vmatprep.subr.mxu0 %v833_v0 }
 0x1e5   :  { %677 = vmatpush3.msra.mxu0 %v171_v7 }
 0x29e   :  { %v326_v18 = vpop.f32.mrf.mxu0 }
 0x29f   :  { %v327_v19 = vadd.f32 %v595_v13, %v326_v18 }
 0x2a0   :  { %v658_v20 = vpop.f32.mrf.mxu0 }
 0x2a1   :  { %707 = vtanh.f32 %v327_v19 }
 0x2ae   :  { %v708_v21 = vpop.eup %707 }
 0x2af   :  { %668 = vmatmul.mubr.msk.f32.vlgmr.msra.gmra.mxu1 %vm182_vm3, %v708_v21 }
 0x2b0   :  { %689 = vmatprep.mubr.msk.f32.mxu1 %vm834_vm0, %v833_v0  ;;  %682 = vmatpush3.msra.mxu1 %v482_v26 }
 0x2b1   :  { %683 = vmatprep.subr.mxu1 %v833_v0 }
 0x2b2   :  { %684 = vmatpush3.msra.mxu1 %v481_v27 }
 0x2b3   :  { %685 = vmatprep.subr.mxu1 %v833_v0 }
 0x2b4   :  { %686 = vmatpush3.msra.mxu1 %v480_v28 }
 0x2b5   :  { %687 = vmatprep.subr.mxu1 %v833_v0 }
 0x2b6   :  { %688 = vmatpush3.msra.mxu1 %v479_v29 }
 0x36f   :  { %v400_v22 = vpop.f32.mrf.mxu1 }
 0x370   :  { %v401_v23 = vadd.f32 %v595_v13, %v400_v22 }
 0x371   :  { %v669_v24 = vpop.f32.mrf.mxu1 }
 0x372   :  { %709 = vtanh.f32 %v401_v23 }
 0x37f   :  { %v710_v25 = vpop.eup %709 }
 0x380   :  { %679 = vmatmul.mubr.msk.f32.vlgmr.msra.gmra.mxu0 %vm182_vm3, %v710_v25 }
 0x440   :  { %v474_v30 = vpop.f32.mrf.mxu0 }
 0x441   :  { %v475_v31 = vadd.f32 %v595_v13, %v474_v30 }
 0x442   :  { %v680_v32 = vpop.f32.mrf.mxu0 }
 0x443   :  { %711 = vtanh.f32 %v475_v31 }
 0x450   :  { %v712_v33 = vpop.eup %711 }
 0x451   :  { %690 = vmatmul.mubr.msk.f32.vlgmr.msra.gmra.mxu1 %vm182_vm3, %v712_v33 }
 0x511   :  { %v559_v35 = vpop.f32.mrf.mxu1 }
 0x512   :  { %v560_v36 = vadd.f32 %v600_v34, %v559_v35 }
 0x513   :  { %v691_v37 = vpop.f32.mrf.mxu1 }
 0x514   :  { %563 = vmax.xlane.f32.xlu0 %v560_v36 }
 0x59d   :  { %v564_v38 = vpop.xlane.xlu0 %563 }
 0x59e   :  { %v565_v39 = vsub.f32 %v560_v36, %v564_v38 }
 0x5a0   :  { %v566_v40 = vmul.f32 1.442695, %v565_v39 }
 0x5a2   :  { %713 = vpow2.f32 %v566_v40 }
 0x5af   :  { %v714_v41 = vpop.eup %713 }
 0x5b0   :  { %568 = vadd.xlane.f32.xlu0 %v714_v41 }
 0x639   :  { %v569_v42 = vpop.xlane.xlu0 %568 }
 0x63a   :  { %715 = vrcp.f32 %v569_v42 }
 0x647   :  { %v716_v43 = vpop.eup %715 }
 0x648   :  { %v571_v44 = vmul.f32 %v716_v43, %v714_v41 }
 0x64a   :  { %572 = vst.msk [vmem:[#allocation10] sm:$0xff] %vm92_vm2, %v571_v44 }
 0x64b   :  { %577 = vsyncadd [#allocation4], 96  ;;  %s835_s26 = smov [#allocation10]  }
 0x64c   :  { %s578_s27 = sshll.u32 %s835_s26, 4  ;;  %s579_s27 = int_to_ptr.vmem [resolvable:$true] %s578_s27 }
 0x64d   :  { %s797_s6 = scalar_lea.vmem %s579_s27, 32  ;;  %s801_s28 = scalar_lea.vmem %s579_s27, 128 }
 0x64e   :  { %p798_p6 = scmp.ne.s32.totalorder %s579_s27, %s797_s6  ;;  %p802_p7 = scmp.lt.s32.totalorder %s579_s27, %s579_s27 }
 0x64f   :  { %p803_p8 = scmp.lt.s32.totalorder %s801_s28, %s797_s6 }
 0x651   :  { %p804_p9 = por %p803_p8, %p802_p7 }
 0x653   :  { %p805_p10 = pnand %p804_p9, %p798_p6 }
 0x655   :  { %808 = shalt.err (!%p805_p10)
}
 0x656   :  { %584 = dma.vmem_to_hbm [thread:$0]  %s579_s27, 32, %s963_s7, [#allocation4], %s829_s12, %s829_s12, %s830_s13  }
 0x657   :  { %823 = dma.done.wait [#allocation4], 128  }
 0x658   :  { %824 = vsyncadd [#allocation4], 4294967168 }
 0x659   :  { %588 = vsyncpa [#allocation3], 1 }
 0x65a   :  { %589 = vsyncpa [#allocation6], 1 }
 0x65b   :  { %590 = vsyncpa [#allocation9], 1 }
 0x65c   :  { %591 = vsyncpa [#allocation4], 1 }

</bundles_post_ra>
